<compile_context>
chip_gen: v7x
topology: tpu7x:2x2x1
jax: 0.10.0
libtpu: 0.0.40
codegen_flags: <defaults>
</compile_context>

<pallas_src>
import jax
import jax.numpy as jnp
from jax.experimental import pallas as pl
from jax.experimental.pallas import tpu as pltpu


def ann_kernel(x_ref, w1_ref, b1_ref, wh_ref, bh_ref, out_ref):
    # Hidden layer: cast the streamed x tile to the compute dtype in-kernel
    # (no separate HBM convert pass), MXU matmul with f32 accumulation.
    x = x_ref[...].astype(w1_ref.dtype)
    h = jnp.dot(x, w1_ref[...], preferred_element_type=jnp.float32)
    h = jnp.maximum(h + b1_ref[...], 0.0)                        # (tb, H) f32

    # Fused heads: one bf16 matmul produces [cls_logit, reg] in two lanes.
    heads = jnp.dot(h.astype(wh_ref.dtype), wh_ref[...],
                    preferred_element_type=jnp.float32)
    heads = heads + bh_ref[...]                                  # (tb, 2) f32

    # sigmoid on lane 0 (classification), identity on lane 1 (regression).
    lane = jax.lax.broadcasted_iota(jnp.int32, heads.shape, dimension=1)
    out_ref[...] = jnp.where(lane == 0, jax.nn.sigmoid(heads),
                             heads).astype(out_ref.dtype)


def _round_up(x, m):
    return (x + m - 1) // m * m


_VMEM_CAP_BYTES = 48 * 1024 * 1024   # conservative across v5e / v6e / v7x


def _vmem_estimate(tb, F, H, x_itemsize, c_itemsize):
    """Rough per-call VMEM footprint (lane/sublane-padded, double buffers)."""
    f_lane = _round_up(F, 128)
    h_lane = _round_up(H, 128)
    x_tiles = 2 * tb * f_lane * x_itemsize          # double-buffered x tile
    out_tiles = 2 * tb * 128 * 4                    # double-buffered out tile
    w1 = 2 * _round_up(F, 16) * h_lane * c_itemsize
    b1 = 2 * 8 * h_lane * 4
    wh = 2 * _round_up(H, 16) * 128 * c_itemsize
    bh = 2 * 8 * 128 * 4
    return x_tiles + out_tiles + w1 + b1 + wh + bh


def ann_forward(x, w1, b1, wc, bc, wr, br, *, tb=1024,
                compute_dtype=jnp.bfloat16):
    """x: [B, F]; w1: [F, H]; b1: [1, H]; wc/wr: [H, 1]; bc/br: [1, 1].

    Returns (o_cls, o_reg), each [B, 1] float32.
    """
    B, F = x.shape
    H = w1.shape[1]
    x_itemsize = jnp.dtype(x.dtype).itemsize
    c_itemsize = jnp.dtype(compute_dtype).itemsize

    # Fuse the two 1-wide heads into one [H, 2] weight and [1, 2] bias.
    w_heads = jnp.concatenate([wc, wr], axis=1).astype(compute_dtype)  # [H, 2]
    b_heads = jnp.concatenate([bc, br], axis=1).astype(jnp.float32)    # [1, 2]

    # ---- batch tiling (no padding; cdiv grid with clipped boundary block) --
    tb_req = max(16, _round_up(min(tb, 4096), 16))
    if B >= 32:
        # >= 2 roughly balanced grid steps whenever the batch allows it, so
        # the "parallel" batch axis can shard across both v7x TensorCores.
        tb_eff = min(tb_req, max(16, _round_up(pl.cdiv(B, 2), 16)))
    else:
        tb_eff = max(8, _round_up(B, 8))
    # Shrink the tile if it would blow the cross-generation VMEM cap.
    while (tb_eff > 16 and
           _vmem_estimate(tb_eff, F, H, x_itemsize, c_itemsize) > _VMEM_CAP_BYTES):
        tb_eff = max(16, _round_up(tb_eff // 2, 16))
    grid = (pl.cdiv(B, tb_eff),)

    vmem_limit = int(min(
        _VMEM_CAP_BYTES,
        max(32 * 1024 * 1024,
            2 * _vmem_estimate(tb_eff, F, H, x_itemsize, c_itemsize))))

    # Small resident operands; only these are converted in the wrapper.
    w1_c = w1.astype(compute_dtype)
    b1_f = b1.astype(jnp.float32)

    cost = pl.CostEstimate(
        flops=2 * B * F * H + 2 * B * H * 2,
        transcendentals=B,
        bytes_accessed=(B * F * x_itemsize + F * H * c_itemsize
                        + H * 2 * c_itemsize + (H + 2) * 4 + B * 2 * 4))

    out = pl.pallas_call(
        ann_kernel,
        out_shape=jax.ShapeDtypeStruct((B, 2), jnp.float32),
        grid_spec=pltpu.PrefetchScalarGridSpec(
            num_scalar_prefetch=0,
            grid=grid,
            in_specs=[
                pl.BlockSpec((tb_eff, F), lambda i: (i, 0)),  # x tile (streamed, source dtype)
                pl.BlockSpec((F, H), lambda i: (0, 0)),       # W1 (resident)
                pl.BlockSpec((1, H), lambda i: (0, 0)),       # b1
                pl.BlockSpec((H, 2), lambda i: (0, 0)),       # fused head W
                pl.BlockSpec((1, 2), lambda i: (0, 0)),       # fused head b
            ],
            out_specs=pl.BlockSpec((tb_eff, 2), lambda i: (i, 0)),
        ),
        compiler_params=pltpu.CompilerParams(
            # Batch axis is embarrassingly parallel -> megacore sharding on v7x.
            dimension_semantics=("parallel",),
            vmem_limit_bytes=vmem_limit),
        cost_estimate=cost,
    )(x, w1_c, b1_f, w_heads, b_heads)

    o_cls = out[:, 0:1]
    o_reg = out[:, 1:2]
    return o_cls, o_reg


def ann_reference(x, w1, b1, wc, bc, wr, br, compute_dtype=jnp.float32):
    cd = compute_dtype
    h = jnp.dot(x.astype(cd), w1.astype(cd), preferred_element_type=jnp.float32)
    h = jnp.maximum(h + b1.astype(jnp.float32), 0.0)
    logit = jnp.dot(h.astype(cd), wc.astype(cd),
                    preferred_element_type=jnp.float32) + bc
    o_cls = jax.nn.sigmoid(logit)
    o_reg = jnp.dot(h.astype(cd), wr.astype(cd),
                    preferred_element_type=jnp.float32) + br
    return o_cls, o_reg


def _make_params(key, F, H):
    kw1, kwc, kwr = jax.random.split(key, 3)
    # _initialize_weights: Linear weights ~ N(0, 0.01), biases = 0.
    w1 = 0.01 * jax.random.normal(kw1, (F, H), dtype=jnp.float32)
    b1 = jnp.zeros((1, H), dtype=jnp.float32)
    wc = 0.01 * jax.random.normal(kwc, (H, 1), dtype=jnp.float32)
    bc = jnp.zeros((1, 1), dtype=jnp.float32)
    wr = 0.01 * jax.random.normal(kwr, (H, 1), dtype=jnp.float32)
    br = jnp.zeros((1, 1), dtype=jnp.float32)
    return w1, b1, wc, bc, wr, br


def _check(B, F, H, tb, key):
    kx, kp = jax.random.split(key)
    x = jax.random.normal(kx, (B, F), dtype=jnp.float32)
    params = _make_params(kp, F, H)

    o_cls, o_reg = ann_forward(x, *params, tb=tb)
    jax.block_until_ready((o_cls, o_reg))
    assert o_cls.shape == (B, 1) and o_reg.shape == (B, 1)
    assert bool(jnp.all(jnp.isfinite(o_cls))) and bool(jnp.all(jnp.isfinite(o_reg)))

    # Tight check against a bf16-consistent reference (same compute dtypes).
    r_cls, r_reg = ann_reference(x, *params, compute_dtype=jnp.bfloat16)
    assert jnp.allclose(o_cls, r_cls, atol=2e-4, rtol=1e-3)
    assert jnp.allclose(o_reg, r_reg, atol=2e-4, rtol=1e-3)

    # Loose sanity check against the pure-f32 reference.
    f_cls, f_reg = ann_reference(x, *params, compute_dtype=jnp.float32)
    assert jnp.allclose(o_cls, f_cls, atol=5e-3, rtol=5e-2)
    assert jnp.allclose(o_reg, f_reg, atol=5e-3, rtol=5e-2)


if __name__ == "__main__":
    # TODO(synk): Dropout(p=0.14) is identity in eval mode; training-mode
    # stochastic dropout (pltpu.prng_*) is not modeled here.

    key = jax.random.PRNGKey(0)
    k1, k2, k3 = jax.random.split(key, 3)

    # Small case consistent with ANN(in_features=64, out_units=[32]); grid=1.
    _check(B=8, F=64, H=32, tb=1024, key=k1)

    # Multi-step grid + partial tail block (exercises pipelining & clipping).
    _check(B=200, F=128, H=32, tb=64, key=k2)

    # Non-divisible small batch -> 2 steps with a clipped boundary block.
    _check(B=50, F=64, H=32, tb=1024, key=k3)

    print("KERNEL_OK")
</pallas_src>

<mosaic_0001>
module attributes {stable_mosaic.version = 11 : i64} {
  func.func @ann_kernel(%arg0: i32, %arg1: memref<8x64xf32, #tpu.memory_space<vmem>>, %arg2: memref<64x32xbf16, #tpu.memory_space<vmem>>, %arg3: memref<1x32xf32, #tpu.memory_space<vmem>>, %arg4: memref<32x2xbf16, #tpu.memory_space<vmem>>, %arg5: memref<1x2xf32, #tpu.memory_space<vmem>>, %arg6: memref<8x2xf32, #tpu.memory_space<vmem>>) attributes {dimension_semantics = [#tpu.dimension_semantics<parallel>], iteration_bounds = array<i64: 1>, scalar_prefetch = 0 : i64, scratch_operands = 0 : i64, tpu.core_type = #tpu.core_type<tc>, window_params = [{transform_indices = @transform_0, window_bounds = array<i64: 8, 64>}, {pipeline_mode = #tpu.pipeline_mode<synchronous>, transform_indices = @transform_1, window_bounds = array<i64: 64, 32>}, {pipeline_mode = #tpu.pipeline_mode<synchronous>, transform_indices = @transform_2, window_bounds = array<i64: 1, 32>}, {pipeline_mode = #tpu.pipeline_mode<synchronous>, transform_indices = @transform_3, window_bounds = array<i64: 32, 2>}, {pipeline_mode = #tpu.pipeline_mode<synchronous>, transform_indices = @transform_4, window_bounds = array<i64: 1, 2>}, {transform_indices = @transform_5, window_bounds = array<i64: 8, 2>}]} {
    %c0 = arith.constant 0 : index
    %c0_0 = arith.constant 0 : index
    %0 = vector.load %arg1[%c0, %c0_0] : memref<8x64xf32, #tpu.memory_space<vmem>>, vector<8x64xf32>
    %1 = arith.truncf %0 : vector<8x64xf32> to vector<8x64xbf16>
    %c0_1 = arith.constant 0 : index
    %c0_2 = arith.constant 0 : index
    %2 = vector.load %arg2[%c0_1, %c0_2] : memref<64x32xbf16, #tpu.memory_space<vmem>>, vector<64x32xbf16>
    %cst = arith.constant dense<0.000000e+00> : vector<8x32xf32>
    %3 = tpu.matmul %1, %2, %cst {dimension_numbers = #tpu.dot_dimension_numbers<[1], [0], [0], [1], [0, 0, 1, 1], [], []>} : vector<8x64xbf16>, vector<64x32xbf16>, vector<8x32xf32> -> vector<8x32xf32>
    %c0_3 = arith.constant 0 : index
    %c0_4 = arith.constant 0 : index
    %4 = vector.load %arg3[%c0_3, %c0_4] : memref<1x32xf32, #tpu.memory_space<vmem>>, vector<1x32xf32>
    %5 = vector.broadcast %4 : vector<1x32xf32> to vector<8x32xf32>
    %6 = arith.addf %3, %5 : vector<8x32xf32>
    %cst_5 = arith.constant 0.000000e+00 : f32
    %7 = vector.broadcast %cst_5 : f32 to vector<8x32xf32>
    %8 = arith.maximumf %6, %7 : vector<8x32xf32>
    %9 = arith.truncf %8 : vector<8x32xf32> to vector<8x32xbf16>
    %c0_6 = arith.constant 0 : index
    %c0_7 = arith.constant 0 : index
    %10 = vector.load %arg4[%c0_6, %c0_7] : memref<32x2xbf16, #tpu.memory_space<vmem>>, vector<32x2xbf16>
    %cst_8 = arith.constant dense<0.000000e+00> : vector<8x2xf32>
    %11 = tpu.matmul %9, %10, %cst_8 {dimension_numbers = #tpu.dot_dimension_numbers<[1], [0], [0], [1], [0, 0, 1, 1], [], []>} : vector<8x32xbf16>, vector<32x2xbf16>, vector<8x2xf32> -> vector<8x2xf32>
    %c0_9 = arith.constant 0 : index
    %c0_10 = arith.constant 0 : index
    %12 = vector.load %arg5[%c0_9, %c0_10] : memref<1x2xf32, #tpu.memory_space<vmem>>, vector<1x2xf32>
    %13 = vector.broadcast %12 : vector<1x2xf32> to vector<8x2xf32>
    %14 = arith.addf %11, %13 : vector<8x2xf32>
    %15 = tpu.iota {dimensions = array<i32: 1>} : vector<8x2xi32>
    %c0_i32 = arith.constant 0 : i32
    %16 = vector.broadcast %c0_i32 : i32 to vector<8x2xi32>
    %17 = arith.cmpi eq, %15, %16 : vector<8x2xi32>
    %18 = arith.negf %14 : vector<8x2xf32>
    %19 = math.exp %18 : vector<8x2xf32>
    %cst_11 = arith.constant 1.000000e+00 : f32
    %20 = vector.broadcast %cst_11 : f32 to vector<8x2xf32>
    %21 = arith.addf %20, %19 : vector<8x2xf32>
    %22 = arith.divf %20, %21 : vector<8x2xf32>
    %23 = arith.select %17, %22, %14 : vector<8x2xi1>, vector<8x2xf32>
    %c0_12 = arith.constant 0 : index
    %c0_13 = arith.constant 0 : index
    %24 = vector.load %arg6[%c0_12, %c0_13] : memref<8x2xf32, #tpu.memory_space<vmem>>, vector<8x2xf32>
    tpu.vector_store %arg6[%c0_12, %c0_13], %23 {strides = array<i32>} : memref<8x2xf32, #tpu.memory_space<vmem>>, vector<8x2xf32>,
    return
  }
  func.func @transform_0(%arg0: i32) -> (i32, i32) {
    %c0_i32 = arith.constant 0 : i32
    %c0_i32_0 = arith.constant 0 : i32
    return %arg0, %c0_i32 : i32, i32
  }
  func.func @transform_1(%arg0: i32) -> (i32, i32) {
    %c0_i32 = arith.constant 0 : i32
    %c0_i32_0 = arith.constant 0 : i32
    %c0_i32_1 = arith.constant 0 : i32
    return %c0_i32, %c0_i32_0 : i32, i32
  }
  func.func @transform_2(%arg0: i32) -> (i32, i32) {
    %c0_i32 = arith.constant 0 : i32
    %c0_i32_0 = arith.constant 0 : i32
    %c0_i32_1 = arith.constant 0 : i32
    return %c0_i32, %c0_i32_0 : i32, i32
  }
  func.func @transform_3(%arg0: i32) -> (i32, i32) {
    %c0_i32 = arith.constant 0 : i32
    %c0_i32_0 = arith.constant 0 : i32
    %c0_i32_1 = arith.constant 0 : i32
    return %c0_i32, %c0_i32_0 : i32, i32
  }
  func.func @transform_4(%arg0: i32) -> (i32, i32) {
    %c0_i32 = arith.constant 0 : i32
    %c0_i32_0 = arith.constant 0 : i32
    %c0_i32_1 = arith.constant 0 : i32
    return %c0_i32, %c0_i32_0 : i32, i32
  }
  func.func @transform_5(%arg0: i32) -> (i32, i32) {
    %c0_i32 = arith.constant 0 : i32
    %c0_i32_0 = arith.constant 0 : i32
    return %arg0, %c0_i32 : i32, i32
  }
}

</mosaic_0001>

<bundles_post_ra>
// kernel: tpu_custom_call.1
= control target key start
LH: loop header
LB: loop body
LE: loop exit
PB: predicated region body
PF: predicated region fallthrough
CT: control target
= control target key end

     0   :  { %v242_v0 = vmov 0.0   ;;  %vm243_vm0 = vmmov 0   ;;  %vm62_vm1 = vcmask 523264   ;;  %vm131_vm2 = vcmask 261120   ;;  %s304_s1 = inlined_call_operand.vmem [shape: bf16[64,32], index: 1, kind: input, shape index: {}]   ;;  %s305_s0 = inlined_call_operand.vmem [shape: f32[8,64], index: 0, kind: input, shape index: {}]   ;;  %s306_s3 = inlined_call_operand.vmem [shape: bf16[32,2], index: 3, kind: input, shape index: {}]   ;;  %s307_s2 = inlined_call_operand.vmem [shape: f32[1,32], index: 2, kind: input, shape index: {}]   ;;  %s308_s4 = inlined_call_operand.vmem [shape: f32[1,2], index: 4, kind: input, shape index: {}]   ;;  %s309_s5 = inlined_call_operand.vmem [shape: f32[8,2], index: 5, kind: output, shape index: {}]  }
   0x1   :  { %210 = vmatprep.subr.bf16.mxu0 %v242_v0  ;;  %v232_v1 = vld [vmem:[%s304_s1] sm:$0xff]   ;;  %218 = vmatprep.mubr.msk.bf16.mxu0 %vm243_vm0, %v242_v0  ;;  %v233_v2 = vld [vmem:[%s304_s1 + $0x8] sm:$0xff]   ;;  %v234_v3 = vld [vmem:[%s304_s1 + $0x10] sm:$0xff]   ;;  %v175_v26 = vlaneseq  ;;  %vm185_vm4 = vcmask 15360  }
   0x2   :  { %222 = vmatprep.subr.bf16.mxu1 %v242_v0  ;;  %226 = vmatprep.mubr.msk.bf16.mxu1 %vm243_vm0, %v242_v0  ;;  %v235_v4 = vld [vmem:[%s304_s1 + $0x18] sm:$0xff]   ;;  %v21_v5 = vld [vmem:[%s305_s0] sm:$0xff]  ;;  %v237_v8 = vld [vmem:[%s306_s3 + $0x8] sm:$0xff]  }
   0x3   :  { %211 = vmatpush3.bf16.msra.mxu0 %v232_v1  ;;  %v22_v6 = vpack.c.bf16 %v21_v5, %v21_v5  ;;  %v236_v7 = vld [vmem:[%s306_s3] sm:$0xff]   ;;  %v176_v27 = vand.u32 127, %v175_v26 }
   0x4   :  { %212 = vmatprep.subr.bf16.mxu0 %v242_v0  ;;  %223 = vmatpush3.bf16.msra.mxu1 %v236_v7  ;;  %v191_v9 = vld [vmem:[%s307_s2] ss:$0 sm:$0xff] }
   0x5   :  { %224 = vmatprep.subr.bf16.mxu1 %v242_v0  ;;  %v197_v17 = vld [vmem:[%s308_s4] ss:$0 sm:$0xff]  ;;  %vm177_vm3 = vcmp.eq.s32.totalorder %v176_v27, 0 }
   0x7   :  { %213 = vmatpush3.bf16.msra.mxu0 %v233_v2 }
   0x8   :  { %214 = vmatprep.subr.bf16.mxu0 %v242_v0  ;;  %225 = vmatpush3.bf16.msra.mxu1 %v237_v8 }
   0xb   :  { %215 = vmatpush3.bf16.msra.mxu0 %v234_v3 }
   0xc   :  { %216 = vmatprep.subr.bf16.mxu0 %v242_v0 }
   0xf   :  { %217 = vmatpush3.bf16.msra.mxu0 %v235_v4 }
  0x12   :  { %219 = vmatmul.mubr.msk.bf16.vlgmr.msra.gmra.mrb[0].mxu0 %vm62_vm1, %v22_v6 }
  0xe5   :  { %v100_v10 = vpop.f32.mrb[0].mxu0 }
  0xe6   :  { %v101_v11 = vadd.f32 %v191_v9, %v100_v10  ;;  %v220_v12 = vpop.f32.mrb[1].mxu0 }
  0xe7   :  { %v103_v13 = vpop.f32.mrb[2].mxu0 }
  0xe8   :  { %v106_v14 = vmax.f32 %v101_v11, 0.0  ;;  %v221_v15 = vpop.f32.mrb[3].mxu0 }
  0xea   :  { %v107_v16 = vpack.c.bf16 %v106_v14, %v106_v14 }
  0xec   :  { %227 = vmatmul.mubr.msk.bf16.vlgmr.msra.gmra.mrb[0].mxu1 %vm131_vm2, %v107_v16 }
 0x1bf   :  { %v169_v18 = vpop.f32.mrb[0].mxu1 }
 0x1c0   :  { %v170_v19 = vadd.f32 %v197_v17, %v169_v18  ;;  %v228_v20 = vpop.f32.mrb[1].mxu1 }
 0x1c1   :  { %v172_v21 = vpop.f32.mrb[2].mxu1 }
 0x1c2   :  { %v201_v22 = vmul.f32 -1.442695, %v170_v19  ;;  %v229_v23 = vpop.f32.mrb[3].mxu1 }
 0x1c4   :  { %238 = vpow2.f32 %v201_v22 }
 0x1ce   :  { %v239_v24 = vpop.eup %238 }
 0x1cf   :  { %v181_v25 = vadd.f32 1.0, %v239_v24 }
 0x1d1   :  { %240 = vrcp.f32 %v181_v25 }
 0x1db   :  { %v241_v28 = vpop.eup %240 }
 0x1dc   :  { %v184_v29 = vsel %vm177_vm3, %v241_v28, %v170_v19 }
 0x1dd   :  { %186 = vst.msk [vmem:[%s309_s5] sm:$0xff] %vm185_vm4, %v184_v29 }

</bundles_post_ra>
